<compile_context>
chip_gen: v7x
topology: tpu7x:2x2x1
jax: 0.10.0
libtpu: 0.0.40
codegen_flags: <defaults>
</compile_context>

<pallas_src>
import functools

import jax
import jax.numpy as jnp
from jax.experimental import pallas as pl
from jax.experimental.pallas import tpu as pltpu

POLICY_LOSS_WEIGHT = 0.15
VALUE_LOSS_WEIGHT = 0.85

NUM_CORES = 2                     # leading "parallel" grid axis (v7x megacore)
_LANES = 128
_TARGET_TILE_BYTES = 2 * 1024 * 1024   # per policy-input tile per grid step


def _cdiv(a, b):
    return (a + b - 1) // b


def _round_up(x, m):
    return ((x + m - 1) // m) * m


# --------------------------------------------------------------------------
# Kernel helpers
# --------------------------------------------------------------------------
def _value_tile_sum(vp_ref, vt_ref, core, step, rvh_pad, batch):
    """Masked sum of (sigmoid(vp) - vt)^2 over one lane-dense value tile.

    vp_ref / vt_ref are (1, rvt, 128) blocks of the padded value slab.
    Returns a (1, 1) f32 partial sum. Padded elements are removed with a
    true select (NOT multiply-by-mask).
    """
    vp = vp_ref[...].astype(jnp.float32)
    vt = vt_ref[...].astype(jnp.float32)
    rvt = vp.shape[1]
    r = jax.lax.broadcasted_iota(jnp.int32, vp.shape, 1)
    l = jax.lax.broadcasted_iota(jnp.int32, vp.shape, 2)
    gidx = core * (rvh_pad * _LANES) + (step * rvt + r) * _LANES + l
    sig = jax.nn.sigmoid(vp)
    sq = (sig - vt) * (sig - vt)
    masked = jnp.where(gidx < batch, sq, 0.0)
    s = jnp.sum(masked, axis=2, keepdims=True)     # (1, rvt, 1)
    s = jnp.sum(s, axis=1, keepdims=True)          # (1, 1, 1)
    return jnp.squeeze(s, axis=0)                  # (1, 1)


def _emit_out(out_ref, total, pol, val):
    """Pack three (1,1) scalars into sublane 0 of the (1,8,128) output block."""
    lane = jax.lax.broadcasted_iota(jnp.int32, out_ref.shape, 2)
    sub = jax.lax.broadcasted_iota(jnp.int32, out_ref.shape, 1)
    row = jnp.where(lane == 0, total,
          jnp.where(lane == 1, pol,
          jnp.where(lane == 2, val, 0.0)))
    out_ref[...] = jnp.where(sub == 0, row, 0.0)


# --------------------------------------------------------------------------
# Kernels
# --------------------------------------------------------------------------
def _loss_kernel_with_policy(pp_ref, pt_ref, vp_ref, vt_ref, out_ref, acc_ref,
                             *, policy_weight, value_weight, inv_b, batch,
                             rvh_pad):
    c = pl.program_id(0)          # core / parallel axis
    i = pl.program_id(1)          # per-core tile index ("arbitrary")
    ni = pl.num_programs(1)
    lane = jax.lax.broadcasted_iota(jnp.int32, (1, _LANES), 1)

    @pl.when(i == 0)
    def _init():
        acc_ref[...] = jnp.zeros_like(acc_ref)

    # ---- value MSE partial: lane-dense tile of the padded value slab ----
    vsum = _value_tile_sum(vp_ref, vt_ref, c, i, rvh_pad, batch)
    acc_ref[...] += jnp.where(lane == 1, vsum, 0.0)

    # ---- policy CE partial: CE(policy_pred, argmax(policy_target, dim=1)) --
    pp = pp_ref[...].astype(jnp.float32)            # (bt, P)
    pt = pt_ref[...].astype(jnp.float32)
    bt, num_classes = pp.shape
    tile = c * ni + i                               # global row-block index
    row = jax.lax.broadcasted_iota(jnp.int32, (bt, 1), 0) + tile * bt
    valid = row < batch                             # masks OOB/garbage rows

    col = jax.lax.broadcasted_iota(jnp.int32, (bt, num_classes), 1)
    # argmax with first-occurrence tie-break (exact-equality ties only).
    pt_max = jnp.max(pt, axis=1, keepdims=True)
    masked_idx = jnp.where(pt == pt_max, col, num_classes)
    target_idx = jnp.min(masked_idx, axis=1, keepdims=True)     # (bt, 1)

    # numerically stable CE without materializing full log-softmax
    m = jnp.max(pp, axis=1, keepdims=True)
    z = pp - m
    lse = jnp.log(jnp.sum(jnp.exp(z), axis=1, keepdims=True))   # (bt, 1)
    # reuse masked_idx (== target_idx exactly at the argmax column)
    picked = jnp.sum(jnp.where(masked_idx == target_idx, z, 0.0),
                     axis=1, keepdims=True)                     # (bt, 1)
    nll = lse - picked                                          # (bt, 1)
    psum = jnp.sum(jnp.where(valid, nll, 0.0), axis=0, keepdims=True)
    acc_ref[...] += jnp.where(lane == 0, psum, 0.0)

    @pl.when(i == ni - 1)
    def _finalize():
        acc = acc_ref[...] * inv_b                  # lane0: pol/B, lane1: val/B
        pol = jnp.sum(jnp.where(lane == 0, acc, 0.0), axis=1, keepdims=True)
        val = jnp.sum(jnp.where(lane == 1, acc, 0.0), axis=1, keepdims=True)
        total = policy_weight * pol + value_weight * val
        _emit_out(out_ref, total, pol, val)


def _loss_kernel_value_only(vp_ref, vt_ref, out_ref, acc_ref, *,
                            value_weight, inv_b, batch, rvh_pad):
    c = pl.program_id(0)
    i = pl.program_id(1)
    ni = pl.num_programs(1)
    lane = jax.lax.broadcasted_iota(jnp.int32, (1, _LANES), 1)

    @pl.when(i == 0)
    def _init():
        acc_ref[...] = jnp.zeros_like(acc_ref)

    vsum = _value_tile_sum(vp_ref, vt_ref, c, i, rvh_pad, batch)
    acc_ref[...] += jnp.where(lane == 1, vsum, 0.0)

    @pl.when(i == ni - 1)
    def _finalize():
        acc = acc_ref[...] * inv_b
        val = jnp.sum(jnp.where(lane == 1, acc, 0.0), axis=1, keepdims=True)
        pol = jnp.zeros((1, 1), jnp.float32)
        total = value_weight * val
        _emit_out(out_ref, total, pol, val)


# --------------------------------------------------------------------------
# Wrapper
# --------------------------------------------------------------------------
def policy_value_loss(policy_pred, value_pred, policy_target, value_target,
                      policy_weight=POLICY_LOSS_WEIGHT,
                      value_weight=VALUE_LOSS_WEIGHT,
                      batch_tile=None, value_rows_tile=None):
    """Returns (total_loss, loss_dict) mirroring PolicyValueLoss.forward."""
    B = int(value_pred.shape[0])
    inv_b = 1.0 / float(B)
    v_item = jnp.dtype(value_pred.dtype).itemsize

    # ---------------- policy tiling (bytes-budget row tile) ----------------
    if policy_target is not None:
        P = int(policy_pred.shape[1])
        p_item = jnp.dtype(policy_pred.dtype).itemsize
        if batch_tile is None:
            rows = _TARGET_TILE_BYTES // max(P * p_item, 1)
            bt = max(8, (min(rows, 8192) // 8) * 8)
        else:
            bt = max(8, (batch_tile // 8) * 8)
        if bt >= B:
            bt = B                       # single full-batch block (full dims)
        nb_p = _cdiv(B, bt)              # number of policy row-blocks
        nbh = _cdiv(nb_p, NUM_CORES)     # grid steps per core
    else:
        nbh = None

    # ---------------- lane-dense value slab --------------------------------
    rv = _cdiv(B, _LANES)                # 128-lane rows holding the B values
    rvh = _cdiv(rv, NUM_CORES)           # rows per core (before padding)
    if policy_target is not None:
        rvt = _round_up(_cdiv(rvh, nbh), 8)          # rows per core per step
    else:
        if value_rows_tile is None:
            max_rows = max(8, _TARGET_TILE_BYTES // (_LANES * v_item))
        else:
            max_rows = max(8, value_rows_tile)
        rvt = min(_round_up(rvh, 8), _round_up(max_rows, 8))
        nbh = _cdiv(rvh, rvt)
    rvh_pad = nbh * rvt
    pad_total = NUM_CORES * rvh_pad * _LANES
    vp_flat = value_pred.reshape(-1)                 # native dtype, no upcast
    vt_flat = value_target.reshape(-1)
    vp_slab = jnp.pad(vp_flat, (0, pad_total - B)).reshape(
        NUM_CORES, rvh_pad, _LANES)
    vt_slab = jnp.pad(vt_flat, (0, pad_total - B)).reshape(
        NUM_CORES, rvh_pad, _LANES)

    out_shape = jax.ShapeDtypeStruct((NUM_CORES, 8, _LANES), jnp.float32)
    out_spec = pl.BlockSpec((1, 8, _LANES), lambda c, i: (c, 0, 0))
    val_spec = pl.BlockSpec((1, rvt, _LANES), lambda c, i: (c, i, 0))
    scratch = [pltpu.VMEM((1, _LANES), jnp.float32)]

    val_tile_bytes = 2 * 2 * rvt * _LANES * v_item   # 2 inputs x 2 buffers
    out_bytes = 2 * NUM_CORES * 8 * _LANES * 4

    if policy_target is None:
        kernel = functools.partial(
            _loss_kernel_value_only,
            value_weight=float(value_weight), inv_b=inv_b, batch=B,
            rvh_pad=rvh_pad)
        est = val_tile_bytes + out_bytes + 4 * _LANES
        vmem_limit = int(min(max(2 * est, 16 * 1024 * 1024), 32 * 1024 * 1024))
        out = pl.pallas_call(
            kernel,
            out_shape=out_shape,
            grid_spec=pltpu.PrefetchScalarGridSpec(
                num_scalar_prefetch=0,
                grid=(NUM_CORES, nbh),
                in_specs=[val_spec, val_spec],
                out_specs=out_spec,
                scratch_shapes=scratch),
            compiler_params=pltpu.CompilerParams(
                dimension_semantics=("parallel", "arbitrary"),
                vmem_limit_bytes=vmem_limit),
        )(vp_slab, vt_slab)
    else:
        # clamp the row-block index so the trailing core never reads a block
        # that is fully out of range; those rows are masked in-kernel anyway.
        pol_spec = pl.BlockSpec(
            (bt, P), lambda c, i: (jnp.minimum(c * nbh + i, nb_p - 1), 0))
        kernel = functools.partial(
            _loss_kernel_with_policy,
            policy_weight=float(policy_weight),
            value_weight=float(value_weight), inv_b=inv_b, batch=B,
            rvh_pad=rvh_pad)
        est = (2 * 2 * bt * P * p_item) + val_tile_bytes + out_bytes + 4 * _LANES
        vmem_limit = int(min(max(2 * est, 16 * 1024 * 1024), 32 * 1024 * 1024))
        out = pl.pallas_call(
            kernel,
            out_shape=out_shape,
            grid_spec=pltpu.PrefetchScalarGridSpec(
                num_scalar_prefetch=0,
                grid=(NUM_CORES, nbh),
                in_specs=[pol_spec, pol_spec, val_spec, val_spec],
                out_specs=out_spec,
                scratch_shapes=scratch),
            compiler_params=pltpu.CompilerParams(
                dimension_semantics=("parallel", "arbitrary"),
                vmem_limit_bytes=vmem_limit),
        )(policy_pred, policy_target, vp_slab, vt_slab)

    # per-core partials are already /B and weighted -> summing rows is exact
    packed = jnp.sum(out, axis=(0, 1))               # (128,)
    total = packed[0]
    pol = packed[1]
    val = packed[2]
    loss_dict = {'total_loss': total, 'policy_loss': pol, 'value_loss': val}
    return total, loss_dict


# --------------------------------------------------------------------------
# Pure-JAX reference + self-test
# --------------------------------------------------------------------------
def _reference(policy_pred, value_pred, policy_target, value_target,
               policy_weight=POLICY_LOSS_WEIGHT,
               value_weight=VALUE_LOSS_WEIGHT):
    vp = value_pred.reshape(-1).astype(jnp.float32)
    vt = value_target.reshape(-1).astype(jnp.float32)
    value_loss = jnp.mean((jax.nn.sigmoid(vp) - vt) ** 2)
    if policy_target is None:
        policy_loss = jnp.float32(0.0)
    else:
        tgt = jnp.argmax(policy_target, axis=1)
        logp = jax.nn.log_softmax(policy_pred.astype(jnp.float32), axis=1)
        policy_loss = -jnp.mean(jnp.take_along_axis(logp, tgt[:, None], axis=1))
    total = policy_weight * policy_loss + value_weight * value_loss
    return total, policy_loss, value_loss


if __name__ == "__main__":
    key = jax.random.PRNGKey(0)
    k1, k2, k3, k4 = jax.random.split(key, 4)

    B = 8      # batch size
    P = 64     # policy_output_size (e.g. 8x8 hex board)

    policy_pred = jax.random.normal(k1, (B, P), dtype=jnp.float32)
    value_pred = jax.random.normal(k2, (B, 1), dtype=jnp.float32)
    policy_target = jax.nn.softmax(
        jax.random.normal(k3, (B, P), dtype=jnp.float32), axis=1)
    value_target = jax.random.uniform(k4, (B, 1), dtype=jnp.float32)

    # ---- kernel run (with policy target, single tile per core)
    total, loss_dict = policy_value_loss(policy_pred, value_pred,
                                         policy_target, value_target)
    jax.block_until_ready(total)
    ref_total, ref_pol, ref_val = _reference(policy_pred, value_pred,
                                             policy_target, value_target)
    assert jnp.allclose(total, ref_total, atol=1e-5), (total, ref_total)
    assert jnp.allclose(loss_dict['policy_loss'], ref_pol, atol=1e-5)
    assert jnp.allclose(loss_dict['value_loss'], ref_val, atol=1e-5)

    # ---- kernel run (policy_target is None: lane-dense value-only path)
    total_np, loss_dict_np = policy_value_loss(policy_pred, value_pred,
                                               None, value_target)
    jax.block_until_ready(total_np)
    ref_total_np, _, ref_val_np = _reference(policy_pred, value_pred,
                                             None, value_target)
    assert jnp.allclose(total_np, ref_total_np, atol=1e-5)
    assert jnp.allclose(loss_dict_np['policy_loss'], 0.0, atol=1e-7)
    assert jnp.allclose(loss_dict_np['value_loss'], ref_val_np, atol=1e-5)

    # ---- multi-tile grid + ragged batch + core split (small forced tile)
    B2 = 20
    kk1, kk2, kk3, kk4 = jax.random.split(jax.random.PRNGKey(1), 4)
    pp2 = jax.random.normal(kk1, (B2, P), dtype=jnp.float32)
    vp2 = jax.random.normal(kk2, (B2, 1), dtype=jnp.float32)
    pt2 = jax.nn.softmax(jax.random.normal(kk3, (B2, P), dtype=jnp.float32), 1)
    vt2 = jax.random.uniform(kk4, (B2, 1), dtype=jnp.float32)
    total2, ld2 = policy_value_loss(pp2, vp2, pt2, vt2, batch_tile=8)
    jax.block_until_ready(total2)
    ref_total2, ref_pol2, ref_val2 = _reference(pp2, vp2, pt2, vt2)
    assert jnp.allclose(total2, ref_total2, atol=1e-5), (total2, ref_total2)
    assert jnp.allclose(ld2['policy_loss'], ref_pol2, atol=1e-5)
    assert jnp.allclose(ld2['value_loss'], ref_val2, atol=1e-5)

    # ---- value-only branch with multiple lane-dense steps per core
    B3 = 3000
    kq1, kq2 = jax.random.split(jax.random.PRNGKey(2), 2)
    vp3 = jax.random.normal(kq1, (B3, 1), dtype=jnp.float32)
    vt3 = jax.random.uniform(kq2, (B3, 1), dtype=jnp.float32)
    total3, ld3 = policy_value_loss(policy_pred, vp3, None, vt3,
                                    value_rows_tile=8)
    jax.block_until_ready(total3)
    ref_total3, _, ref_val3 = _reference(policy_pred, vp3, None, vt3)
    assert jnp.allclose(total3, ref_total3, atol=1e-5), (total3, ref_total3)
    assert jnp.allclose(ld3['value_loss'], ref_val3, atol=1e-5)

    print("KERNEL_OK")
</pallas_src>

<mosaic_0001>
module attributes {stable_mosaic.version = 11 : i64} {
  func.func @_loss_kernel_with_policy(%arg0: i32, %arg1: i32, %arg2: memref<8x64xf32, #tpu.memory_space<vmem>>, %arg3: memref<8x64xf32, #tpu.memory_space<vmem>>, %arg4: memref<1x8x128xf32, #tpu.memory_space<vmem>>, %arg5: memref<1x8x128xf32, #tpu.memory_space<vmem>>, %arg6: memref<1x8x128xf32, #tpu.memory_space<vmem>>, %arg7: memref<1x128xf32, #tpu.memory_space<vmem>>) attributes {dimension_semantics = [#tpu.dimension_semantics<parallel>, #tpu.dimension_semantics<arbitrary>], iteration_bounds = array<i64: 2, 1>, scalar_prefetch = 0 : i64, scratch_operands = 1 : i64, tpu.core_type = #tpu.core_type<tc>, window_params = [{transform_indices = @transform_0, window_bounds = array<i64: 8, 64>}, {transform_indices = @transform_1, window_bounds = array<i64: 8, 64>}, {transform_indices = @transform_2, window_bounds = array<i64: 1, 8, 128>}, {transform_indices = @transform_3, window_bounds = array<i64: 1, 8, 128>}, {transform_indices = @transform_4, window_bounds = array<i64: 1, 8, 128>}]} {
    %0 = tpu.iota {dimensions = array<i32: 1>} : vector<1x128xi32>
    %c0_i32 = arith.constant 0 : i32
    %1 = arith.cmpi eq, %arg1, %c0_i32 : i32
    %2 = arith.extui %1 : i1 to i32
    %c0_i32_0 = arith.constant 0 : i32
    %3 = arith.cmpi ne, %2, %c0_i32_0 : i32
    scf.if %3 {
      %cst_38 = arith.constant 0.000000e+00 : f32
      %93 = vector.broadcast %cst_38 : f32 to vector<1x128xf32>
      %c0_39 = arith.constant 0 : index
      %c0_40 = arith.constant 0 : index
      %94 = vector.load %arg7[%c0_39, %c0_40] : memref<1x128xf32, #tpu.memory_space<vmem>>, vector<1x128xf32>
      tpu.vector_store %arg7[%c0_39, %c0_40], %93 {strides = array<i32>} : memref<1x128xf32, #tpu.memory_space<vmem>>, vector<1x128xf32>,
    } else {
    }
    %c0 = arith.constant 0 : index
    %c0_1 = arith.constant 0 : index
    %c0_2 = arith.constant 0 : index
    %4 = vector.load %arg4[%c0, %c0_1, %c0_2] : memref<1x8x128xf32, #tpu.memory_space<vmem>>, vector<1x8x128xf32>
    %c0_3 = arith.constant 0 : index
    %c0_4 = arith.constant 0 : index
    %c0_5 = arith.constant 0 : index
    %5 = vector.load %arg5[%c0_3, %c0_4, %c0_5] : memref<1x8x128xf32, #tpu.memory_space<vmem>>, vector<1x8x128xf32>
    %6 = tpu.iota {dimensions = array<i32: 1>} : vector<1x8x128xi32>
    %7 = tpu.iota {dimensions = array<i32: 2>} : vector<1x8x128xi32>
    %c1024_i32 = arith.constant 1024 : i32
    %8 = arith.muli %arg0, %c1024_i32 : i32
    %c8_i32 = arith.constant 8 : i32
    %9 = arith.muli %arg1, %c8_i32 : i32
    %10 = vector.broadcast %9 : i32 to vector<1x8x128xi32>
    %11 = arith.addi %10, %6 : vector<1x8x128xi32>
    %c128_i32 = arith.constant 128 : i32
    %12 = vector.broadcast %c128_i32 : i32 to vector<1x8x128xi32>
    %13 = arith.muli %11, %12 : vector<1x8x128xi32>
    %14 = vector.broadcast %8 : i32 to vector<1x8x128xi32>
    %15 = arith.addi %14, %13 : vector<1x8x128xi32>
    %16 = arith.addi %15, %7 : vector<1x8x128xi32>
    %17 = arith.negf %4 : vector<1x8x128xf32>
    %18 = math.exp %17 : vector<1x8x128xf32>
    %cst = arith.constant 1.000000e+00 : f32
    %19 = vector.broadcast %cst : f32 to vector<1x8x128xf32>
    %20 = arith.addf %19, %18 : vector<1x8x128xf32>
    %21 = arith.divf %19, %20 : vector<1x8x128xf32>
    %22 = arith.subf %21, %5 : vector<1x8x128xf32>
    %23 = arith.subf %21, %5 : vector<1x8x128xf32>
    %24 = arith.mulf %22, %23 : vector<1x8x128xf32>
    %c8_i32_6 = arith.constant 8 : i32
    %25 = vector.broadcast %c8_i32_6 : i32 to vector<1x8x128xi32>
    %26 = arith.cmpi slt, %16, %25 : vector<1x8x128xi32>
    %cst_7 = arith.constant 0.000000e+00 : f32
    %27 = vector.broadcast %cst_7 : f32 to vector<1x8x128xf32>
    %28 = arith.select %26, %24, %27 : vector<1x8x128xi1>, vector<1x8x128xf32>
    %cst_8 = arith.constant dense<0.000000e+00> : vector<1x8xf32>
    %29 = vector.multi_reduction <add>, %28, %cst_8 [2] : vector<1x8x128xf32> to vector<1x8xf32>
    %30 = vector.shape_cast %29 : vector<1x8xf32> to vector<1x8x1xf32>
    %cst_9 = arith.constant dense<0.000000e+00> : vector<1x1xf32>
    %31 = vector.multi_reduction <add>, %30, %cst_9 [1] : vector<1x8x1xf32> to vector<1x1xf32>
    %32 = vector.shape_cast %31 : vector<1x1xf32> to vector<1x1x1xf32>
    %33 = vector.shape_cast %32 : vector<1x1x1xf32> to vector<1x1xf32>
    %c0_10 = arith.constant 0 : index
    %c0_11 = arith.constant 0 : index
    %34 = vector.load %arg7[%c0_10, %c0_11] : memref<1x128xf32, #tpu.memory_space<vmem>>, vector<1x128xf32>
    %c1_i32 = arith.constant 1 : i32
    %35 = vector.broadcast %c1_i32 : i32 to vector<1x128xi32>
    %36 = arith.cmpi eq, %0, %35 : vector<1x128xi32>
    %cst_12 = arith.constant 0.000000e+00 : f32
    %37 = vector.shape_cast %33 : vector<1x1xf32> to vector<1x1xf32>
    %38 = vector.broadcast %37 : vector<1x1xf32> to vector<1x128xf32>
    %39 = vector.broadcast %cst_12 : f32 to vector<1x128xf32>
    %40 = arith.select %36, %38, %39 : vector<1x128xi1>, vector<1x128xf32>
    %41 = arith.addf %34, %40 : vector<1x128xf32>
    %c0_13 = arith.constant 0 : index
    %c0_14 = arith.constant 0 : index
    %42 = vector.load %arg7[%c0_13, %c0_14] : memref<1x128xf32, #tpu.memory_space<vmem>>, vector<1x128xf32>
    tpu.vector_store %arg7[%c0_13, %c0_14], %41 {strides = array<i32>} : memref<1x128xf32, #tpu.memory_space<vmem>>, vector<1x128xf32>,
    %c0_15 = arith.constant 0 : index
    %c0_16 = arith.constant 0 : index
    %43 = vector.load %arg2[%c0_15, %c0_16] : memref<8x64xf32, #tpu.memory_space<vmem>>, vector<8x64xf32>
    %c0_17 = arith.constant 0 : index
    %c0_18 = arith.constant 0 : index
    %44 = vector.load %arg3[%c0_17, %c0_18] : memref<8x64xf32, #tpu.memory_space<vmem>>, vector<8x64xf32>
    %c1_i32_19 = arith.constant 1 : i32
    %45 = arith.muli %arg0, %c1_i32_19 : i32
    %46 = arith.addi %45, %arg1 : i32
    %47 = tpu.iota {dimensions = array<i32: 0>} : vector<8x1xi32>
    %c8_i32_20 = arith.constant 8 : i32
    %48 = arith.muli %46, %c8_i32_20 : i32
    %49 = vector.broadcast %48 : i32 to vector<8x1xi32>
    %50 = arith.addi %47, %49 : vector<8x1xi32>
    %c8_i32_21 = arith.constant 8 : i32
    %51 = vector.broadcast %c8_i32_21 : i32 to vector<8x1xi32>
    %52 = arith.cmpi slt, %50, %51 : vector<8x1xi32>
    %53 = tpu.iota {dimensions = array<i32: 1>} : vector<8x64xi32>
    %cst_22 = arith.constant dense<0xFF800000> : vector<8xf32>
    %54 = vector.multi_reduction <maximumf>, %44, %cst_22 [1] : vector<8x64xf32> to vector<8xf32>
    %55 = vector.shape_cast %54 : vector<8xf32> to vector<8x1xf32>
    %56 = vector.broadcast %55 : vector<8x1xf32> to vector<8x64xf32>
    %57 = arith.cmpf oeq, %44, %56 : vector<8x64xf32>
    %c64_i32 = arith.constant 64 : i32
    %58 = vector.broadcast %c64_i32 : i32 to vector<8x64xi32>
    %59 = arith.select %57, %53, %58 : vector<8x64xi1>, vector<8x64xi32>
    %cst_23 = arith.constant dense<2147483647> : vector<8xi32>
    %60 = vector.multi_reduction <minsi>, %59, %cst_23 [1] : vector<8x64xi32> to vector<8xi32>
    %61 = vector.shape_cast %60 : vector<8xi32> to vector<8x1xi32>
    %cst_24 = arith.constant dense<0xFF800000> : vector<8xf32>
    %62 = vector.multi_reduction <maximumf>, %43, %cst_24 [1] : vector<8x64xf32> to vector<8xf32>
    %63 = vector.shape_cast %62 : vector<8xf32> to vector<8x1xf32>
    %64 = vector.broadcast %63 : vector<8x1xf32> to vector<8x64xf32>
    %65 = arith.subf %43, %64 : vector<8x64xf32>
    %66 = math.exp %65 : vector<8x64xf32>
    %cst_25 = arith.constant dense<0.000000e+00> : vector<8xf32>
    %67 = vector.multi_reduction <add>, %66, %cst_25 [1] : vector<8x64xf32> to vector<8xf32>
    %68 = vector.shape_cast %67 : vector<8xf32> to vector<8x1xf32>
    %69 = math.log %68 : vector<8x1xf32>
    %70 = vector.broadcast %61 : vector<8x1xi32> to vector<8x64xi32>
    %71 = arith.cmpi eq, %59, %70 : vector<8x64xi32>
    %cst_26 = arith.constant 0.000000e+00 : f32
    %72 = vector.broadcast %cst_26 : f32 to vector<8x64xf32>
    %73 = arith.select %71, %65, %72 : vector<8x64xi1>, vector<8x64xf32>
    %cst_27 = arith.constant dense<0.000000e+00> : vector<8xf32>
    %74 = vector.multi_reduction <add>, %73, %cst_27 [1] : vector<8x64xf32> to vector<8xf32>
    %75 = vector.shape_cast %74 : vector<8xf32> to vector<8x1xf32>
    %76 = arith.subf %69, %75 : vector<8x1xf32>
    %cst_28 = arith.constant 0.000000e+00 : f32
    %77 = vector.broadcast %cst_28 : f32 to vector<8x1xf32>
    %78 = arith.select %52, %76, %77 : vector<8x1xi1>, vector<8x1xf32>
    %cst_29 = arith.constant dense<0.000000e+00> : vector<1xf32>
    %79 = vector.multi_reduction <add>, %78, %cst_29 [0] : vector<8x1xf32> to vector<1xf32>
    %80 = vector.shape_cast %79 : vector<1xf32> to vector<1x1xf32>
    %c0_30 = arith.constant 0 : index
    %c0_31 = arith.constant 0 : index
    %81 = vector.load %arg7[%c0_30, %c0_31] : memref<1x128xf32, #tpu.memory_space<vmem>>, vector<1x128xf32>
    %c0_i32_32 = arith.constant 0 : i32
    %82 = vector.broadcast %c0_i32_32 : i32 to vector<1x128xi32>
    %83 = arith.cmpi eq, %0, %82 : vector<1x128xi32>
    %cst_33 = arith.constant 0.000000e+00 : f32
    %84 = vector.shape_cast %80 : vector<1x1xf32> to vector<1x1xf32>
    %85 = vector.broadcast %84 : vector<1x1xf32> to vector<1x128xf32>
    %86 = vector.broadcast %cst_33 : f32 to vector<1x128xf32>
    %87 = arith.select %83, %85, %86 : vector<1x128xi1>, vector<1x128xf32>
    %88 = arith.addf %81, %87 : vector<1x128xf32>
    %c0_34 = arith.constant 0 : index
    %c0_35 = arith.constant 0 : index
    %89 = vector.load %arg7[%c0_34, %c0_35] : memref<1x128xf32, #tpu.memory_space<vmem>>, vector<1x128xf32>
    tpu.vector_store %arg7[%c0_34, %c0_35], %88 {strides = array<i32>} : memref<1x128xf32, #tpu.memory_space<vmem>>, vector<1x128xf32>,
    %c0_i32_36 = arith.constant 0 : i32
    %90 = arith.cmpi eq, %arg1, %c0_i32_36 : i32
    %91 = arith.extui %90 : i1 to i32
    %c0_i32_37 = arith.constant 0 : i32
    %92 = arith.cmpi ne, %91, %c0_i32_37 : i32
    scf.if %92 {
      %c0_38 = arith.constant 0 : index
      %c0_39 = arith.constant 0 : index
      %93 = vector.load %arg7[%c0_38, %c0_39] : memref<1x128xf32, #tpu.memory_space<vmem>>, vector<1x128xf32>
      %cst_40 = arith.constant 1.250000e-01 : f32
      %94 = vector.broadcast %cst_40 : f32 to vector<1x128xf32>
      %95 = arith.mulf %93, %94 : vector<1x128xf32>
      %c0_i32_41 = arith.constant 0 : i32
      %96 = vector.broadcast %c0_i32_41 : i32 to vector<1x128xi32>
      %97 = arith.cmpi eq, %0, %96 : vector<1x128xi32>
      %cst_42 = arith.constant 0.000000e+00 : f32
      %98 = vector.broadcast %cst_42 : f32 to vector<1x128xf32>
      %99 = arith.select %97, %95, %98 : vector<1x128xi1>, vector<1x128xf32>
      %cst_43 = arith.constant dense<0.000000e+00> : vector<1xf32>
      %100 = vector.multi_reduction <add>, %99, %cst_43 [1] : vector<1x128xf32> to vector<1xf32>
      %101 = vector.shape_cast %100 : vector<1xf32> to vector<1x1xf32>
      %c1_i32_44 = arith.constant 1 : i32
      %102 = vector.broadcast %c1_i32_44 : i32 to vector<1x128xi32>
      %103 = arith.cmpi eq, %0, %102 : vector<1x128xi32>
      %cst_45 = arith.constant 0.000000e+00 : f32
      %104 = vector.broadcast %cst_45 : f32 to vector<1x128xf32>
      %105 = arith.select %103, %95, %104 : vector<1x128xi1>, vector<1x128xf32>
      %cst_46 = arith.constant dense<0.000000e+00> : vector<1xf32>
      %106 = vector.multi_reduction <add>, %105, %cst_46 [1] : vector<1x128xf32> to vector<1xf32>
      %107 = vector.shape_cast %106 : vector<1xf32> to vector<1x1xf32>
      %cst_47 = arith.constant 1.500000e-01 : f32
      %108 = vector.broadcast %cst_47 : f32 to vector<1x1xf32>
      %109 = arith.mulf %108, %101 : vector<1x1xf32>
      %cst_48 = arith.constant 8.500000e-01 : f32
      %110 = vector.broadcast %cst_48 : f32 to vector<1x1xf32>
      %111 = arith.mulf %110, %107 : vector<1x1xf32>
      %112 = arith.addf %109, %111 : vector<1x1xf32>
      %113 = tpu.iota {dimensions = array<i32: 2>} : vector<1x8x128xi32>
      %114 = tpu.iota {dimensions = array<i32: 1>} : vector<1x8x128xi32>
      %c0_i32_49 = arith.constant 0 : i32
      %115 = vector.broadcast %c0_i32_49 : i32 to vector<1x8x128xi32>
      %116 = arith.cmpi eq, %113, %115 : vector<1x8x128xi32>
      %c1_i32_50 = arith.constant 1 : i32
      %117 = vector.broadcast %c1_i32_50 : i32 to vector<1x8x128xi32>
      %118 = arith.cmpi eq, %113, %117 : vector<1x8x128xi32>
      %c2_i32 = arith.constant 2 : i32
      %119 = vector.broadcast %c2_i32 : i32 to vector<1x8x128xi32>
      %120 = arith.cmpi eq, %113, %119 : vector<1x8x128xi32>
      %cst_51 = arith.constant 0.000000e+00 : f32
      %121 = vector.shape_cast %107 : vector<1x1xf32> to vector<1x1x1xf32>
      %122 = vector.broadcast %121 : vector<1x1x1xf32> to vector<1x8x128xf32>
      %123 = vector.broadcast %cst_51 : f32 to vector<1x8x128xf32>
      %124 = arith.select %120, %122, %123 : vector<1x8x128xi1>, vector<1x8x128xf32>
      %125 = vector.shape_cast %101 : vector<1x1xf32> to vector<1x1x1xf32>
      %126 = vector.broadcast %125 : vector<1x1x1xf32> to vector<1x8x128xf32>
      %127 = arith.select %118, %126, %124 : vector<1x8x128xi1>, vector<1x8x128xf32>
      %128 = vector.shape_cast %112 : vector<1x1xf32> to vector<1x1x1xf32>
      %129 = vector.broadcast %128 : vector<1x1x1xf32> to vector<1x8x128xf32>
      %130 = arith.select %116, %129, %127 : vector<1x8x128xi1>, vector<1x8x128xf32>
      %c0_i32_52 = arith.constant 0 : i32
      %131 = vector.broadcast %c0_i32_52 : i32 to vector<1x8x128xi32>
      %132 = arith.cmpi eq, %114, %131 : vector<1x8x128xi32>
      %cst_53 = arith.constant 0.000000e+00 : f32
      %133 = vector.broadcast %cst_53 : f32 to vector<1x8x128xf32>
      %134 = arith.select %132, %130, %133 : vector<1x8x128xi1>, vector<1x8x128xf32>
      %c0_54 = arith.constant 0 : index
      %c0_55 = arith.constant 0 : index
      %c0_56 = arith.constant 0 : index
      %135 = vector.load %arg6[%c0_54, %c0_55, %c0_56] : memref<1x8x128xf32, #tpu.memory_space<vmem>>, vector<1x8x128xf32>
      tpu.vector_store %arg6[%c0_54, %c0_55, %c0_56], %134 {strides = array<i32>} : memref<1x8x128xf32, #tpu.memory_space<vmem>>, vector<1x8x128xf32>,
    } else {
    }
    return
  }
  func.func @transform_0(%arg0: i32, %arg1: i32) -> (i32, i32) {
    %c1_i32 = arith.constant 1 : i32
    %0 = arith.muli %arg0, %c1_i32 : i32
    %1 = arith.addi %0, %arg1 : i32
    %c0_i32 = arith.constant 0 : i32
    %2 = arith.minsi %1, %c0_i32 : i32
    %c0_i32_0 = arith.constant 0 : i32
    %c0_i32_1 = arith.constant 0 : i32
    return %2, %c0_i32_0 : i32, i32
  }
  func.func @transform_1(%arg0: i32, %arg1: i32) -> (i32, i32) {
    %c1_i32 = arith.constant 1 : i32
    %0 = arith.muli %arg0, %c1_i32 : i32
    %1 = arith.addi %0, %arg1 : i32
    %c0_i32 = arith.constant 0 : i32
    %2 = arith.minsi %1, %c0_i32 : i32
    %c0_i32_0 = arith.constant 0 : i32
    %c0_i32_1 = arith.constant 0 : i32
    return %2, %c0_i32_0 : i32, i32
  }
  func.func @transform_2(%arg0: i32, %arg1: i32) -> (i32, i32, i32) {
    %c0_i32 = arith.constant 0 : i32
    %c0_i32_0 = arith.constant 0 : i32
    return %arg0, %arg1, %c0_i32 : i32, i32, i32
  }
  func.func @transform_3(%arg0: i32, %arg1: i32) -> (i32, i32, i32) {
    %c0_i32 = arith.constant 0 : i32
    %c0_i32_0 = arith.constant 0 : i32
    return %arg0, %arg1, %c0_i32 : i32, i32, i32
  }
  func.func @transform_4(%arg0: i32, %arg1: i32) -> (i32, i32, i32) {
    %c0_i32 = arith.constant 0 : i32
    %c0_i32_0 = arith.constant 0 : i32
    %c0_i32_1 = arith.constant 0 : i32
    return %arg0, %c0_i32, %c0_i32_0 : i32, i32, i32
  }
}

</mosaic_0001>

<bundles_post_ra>
// kernel: tpu_custom_call.1
= control target key start
LH: loop header
LB: loop body
LE: loop exit
PB: predicated region body
PF: predicated region fallthrough
CT: control target
= control target key end

     0   :  { %s1396_s0 = inlined_call_operand.hbm [shape: f32[8,64], index: 0, kind: input, shape index: {}]   ;;  %s1397_s1 = inlined_call_operand.hbm [shape: f32[8,64], index: 1, kind: input, shape index: {}]   ;;  %s1398_s2 = inlined_call_operand.hbm [shape: f32[2,8,128], index: 2, kind: input, shape index: {}]   ;;  %s1399_s3 = inlined_call_operand.hbm [shape: f32[2,8,128], index: 3, kind: input, shape index: {}]   ;;  %s1400_s4 = inlined_call_operand.hbm [shape: f32[2,8,128], index: 4, kind: output, shape index: {}]  }
   0x1   :  { %1408 = sst [smem:[#allocation18_spill]] %s1396_s0 }
   0x2   :  { %1409 = sst [smem:[#allocation19_spill]] %s1397_s1 }
   0x3   :  { %9 = vsyncpa [#allocation4], 0 }
   0x4   :  { %11 = vsyncpa [#allocation4 + $0x1], 0 }
   0x5   :  { %12 = vsyncpa [#allocation7], 0 }
   0x6   :  { %14 = vsyncpa [#allocation7 + $0x1], 0 }
   0x7   :  { %15 = vsyncpa [#allocation10], 0 }
   0x8   :  { %17 = vsyncpa [#allocation10 + $0x1], 0 }
   0x9   :  { %18 = vsyncpa [#allocation5], 0 }
   0xa   :  { %20 = vsyncpa [#allocation5 + $0x1], 0  ;;  %s1061_s15 = smov 0   ;;  %s1063_s16 = smov 0  }
   0xb   :  { %s1065_s17 = smov 0   ;;  %s1067_s18 = smov 0  }
   0xc   :  { %s1069_s19 = smov 0   ;;  %s1071_s20 = smov 0  }
   0xd   :  { %s1073_s21 = smov 0   ;;  %s1075_s22 = smov 0  }
   0xe LB: > { %s1100_s23 = sadd.s32 4294967295, %s1028_s22   ;;  %s659_s24 = sadd.s32 4294967294, %s1028_s22   ;;  %s1028_s22 = sphi %s1075_s22, %s26_s22   ;;  %s1024_s21 = sphi %s1073_s21, %s1436_s21   ;;  %s1020_s20 = sphi %s1071_s20, %s1435_s20   ;;  %s1016_s19 = sphi %s1069_s19, %s1386_s19   ;;  %s1012_s18 = sphi %s1067_s18, %s1434_s18   ;;  %s1008_s17 = sphi %s1065_s17, %s1433_s17   ;;  %s1004_s16 = sphi %s1063_s16, %s1432_s16   ;;  %s1000_s15 = sphi %s1061_s15, %s1431_s15  }
   0xf   : > { %s38_s25 = sadd.s32 1, %s1024_s21  ;;  %p997_p1 = scmp.ne.s32.totalorder %s1016_s19, 0 }
  0x10   : > { %p40_p0 = scmp.ge.s32.totalorder %s38_s25, 2  ;;  %p59_p2 = scmp.eq.s32.totalorder %s1028_s22, 0 }
  0x11   : > { %p64_p3 = scmp.ne.s32.totalorder %s1016_s19, %s1012_s18  ;;  %p65_p5 = scmp.eq.s32.totalorder %s1100_s23, 0 }
  0x12   : > { %s1438_s25 = smov (%p40_p0, %s38_s25), 0  ;;  %p1111_p4 = por %p997_p1, %p59_p2 }
  0x13   : > { %1410 = sst [smem:[#allocation17_spill]] %s1438_s25  ;;  %p1116_p6 = por %p65_p5, %p64_p3 }
  0x14   : > { %s106_s28 = ssub.s32 %s1024_s21, %s1438_s25  ;;  %s111_s29 = sadd.s32 1, %s1008_s17 }
  0x15   : > { %s1412_s27 = scalar_select %p1116_p6, 1, 0 }
  0x16   : > { %p109_p7 = scmp.eq.s32.totalorder %s106_s28, 0  ;;  %p118_p8 = scmp.ne.s32.totalorder %s1008_s17, %s1004_s16 }
  0x17   : > { %p124_p9 = scmp.ne.s32.totalorder %s1004_s16, %s1000_s15  ;;  %p176_p10 = scmp.eq.s32.totalorder %s1100_s23, 1 }
  0x18   : > { %s1124_s30 = scalar_select %p109_p7, %s1008_s17, %s111_s29  }
  0x19   : > { %p182_p11 = scmp.eq.s32.totalorder %s659_s24, 1  ;;  %p120_p12 = por %p118_p8, %p59_p2 }
  0x1a   : > { %p1133_p13 = por %p124_p9, %p65_p5  ;;  %p1137_p0 = por %p176_p10, %p118_p8 }
  0x1b   : > { %p1141_p1 = por %p182_p11, %p124_p9  ;;  %p710_p7 = scmp.lt.s32.totalorder %s1028_s22, 2 }
  0x1c   : > { %s1413_s5 = scalar_select %p1133_p13, 1, 0 }
  0x1d   : > { %s1414_s6 = scalar_select %p1137_p0, 1, 0 }
  0x1e   : > { %s1415_s7 = scalar_select %p1141_p1, 1, 0 }
  0x1f   : > { %p1149_p6 = pnand %p710_p7, %p1111_p4  ;;  %s223_s9 = sand.u32 1, %s1028_s22  }
  0x20   : > { %s1030_s10 = smov [#allocation6]   ;;  %p1154_p2 = pnand %p710_p7, %p120_p12 }
  0x21   : > { %s237_s11 = sshll.u32 %s1030_s10, 4  ;;  %s1158_s13 = scalar_lea.sflag [#allocation7], %s223_s9  ;;  %s238_s11 = int_to_ptr.vmem [resolvable:$true] %s237_s11 }
  0x22   : > { %s1417_s12 = scalar_select %p1154_p2, 1, 0 }
  0x23   : > { %s1418_s1 = sld [smem:[#allocation19_spill]]  ;;  %p795_p5 = pneg %p1149_p6 }
  0x29   : > { %s793_s24 = scalar_lea.hbm %s1418_s1, 128 }
  0x2a   : > { %p794_p4 = scmp.ne.s32.totalorder %s1418_s1, %s793_s24  ;;  %p800_p10 = scmp.lt.u32.totalorder %s793_s24, %s793_s24 }
  0x2b   : > { %p802_p11 = scmp.lt.u32.totalorder %s793_s24, %s1418_s1 }
  0x2c   : > { %p796_p8 = pnand %p795_p5, %p794_p4 }
  0x2d   : > { %p803_p12 = por %p802_p11, %p800_p10 }
  0x2e   : > { %p797_p9 = pneg %p796_p8 }
  0x30   : > { %p804_p7 = pnand %p803_p12, %p797_p9 }
  0x32   : > { %807 = shalt.err (!%p804_p7)
}
  0x33   : > { %s808_s9 = scalar_lea.vmem %s238_s11, 128  ;;  %s815_s14 = scalar_lea.vmem %s238_s11, 256 }
  0x34   : > { %p809_p3 = scmp.ne.s32.totalorder %s238_s11, %s808_s9  ;;  %p816_p13 = scmp.lt.s32.totalorder %s238_s11, %s238_s11 }
  0x35   : > { %p817_p2 = scmp.lt.s32.totalorder %s815_s14, %s808_s9 }
  0x36   : > { %p811_p1 = pnand %p809_p3, %p795_p5 }
  0x37   : > { %p818_p4 = por %p817_p2, %p816_p13 }
  0x38   : > { %p812_p0 = pneg %p811_p1 }
  0x3a   : > { %p819_p8 = pnand %p818_p4, %p812_p0 }
  0x3c   : > { %822 = shalt.err (!%p819_p8)
}
  0x3d   : > { %699 = dma.hbm_to_vmem [thread:$0]  (!%p1149_p6), %s1418_s1, 128, %s238_s11, %s1158_s13  }
  0x3e   : > { %p670_p9 = scmp.ge.s32.totalorder %s1028_s22, 1  ;;  %p280_p3 = scmp.lt.s32.totalorder %s1028_s22, 3 }
  0x3f   : > { %s1031_s28 = smov [#allocation3]   ;;  %s1406_s10 = sand.u32 1, %s1008_s17  }
  0x40   : > { %p1185_p1 = pnand %p670_p9, %p280_p3  ;;  %s216_s29 = sshll.u32 %s1031_s28, 4  ;;  %s217_s29 = int_to_ptr.vmem [resolvable:$true] %s216_s29 }
  0x41   : > { %s1420_s0 = sld [smem:[#allocation18_spill]] }
  0x42   : > { %s1419_s26 = scalar_select %p1185_p1, 1, 0 }
  0x47   : > { %s823_s25 = scalar_lea.hbm %s1420_s0, 128 }
  0x48   : > { %p824_p13 = scmp.ne.s32.totalorder %s1420_s0, %s823_s25  ;;  %p830_p10 = scmp.lt.u32.totalorder %s823_s25, %s823_s25 }
  0x49   : > { %p832_p11 = scmp.lt.u32.totalorder %s823_s25, %s1420_s0 }
  0x4a   : > { %p826_p0 = pnand %p824_p13, %p795_p5 }
  0x4b   : > { %p833_p12 = por %p832_p11, %p830_p10 }
  0x4c   : > { %p827_p2 = pneg %p826_p0 }
  0x4e   : > { %p834_p7 = pnand %p833_p12, %p827_p2 }
  0x50   : > { %837 = shalt.err (!%p834_p7)
}
  0x51   : > { %s838_s28 = scalar_lea.vmem %s217_s29, 128  ;;  %s845_s9 = scalar_lea.vmem %s217_s29, 256 }
  0x52   : > { %p839_p4 = scmp.ne.s32.totalorder %s217_s29, %s838_s28  ;;  %p846_p3 = scmp.lt.s32.totalorder %s217_s29, %s217_s29 }
  0x53   : > { %p847_p1 = scmp.lt.s32.totalorder %s845_s9, %s838_s28 }
  0x54   : > { %p841_p8 = pnand %p839_p4, %p795_p5 }
  0x55   : > { %p848_p13 = por %p847_p1, %p846_p3 }
  0x56   : > { %p842_p9 = pneg %p841_p8 }
  0x58   : > { %p849_p0 = pnand %p848_p13, %p842_p9 }
  0x5a   : > { %852 = shalt.err (!%p849_p0)
}
  0x5b   : > { %696 = dma.hbm_to_vmem [thread:$0]  (!%p1149_p6), %s1420_s0, 128, %s217_s29, [#allocation4]  }
  0x5c   : > { %s1212_s14 = sshll.u32 %s1406_s10, 3  ;;  %s1407_s18 = sshll.u32 %s1024_s21, 7 }
  0x5d   : > { %s1220_s28 = scalar_lea.hbm %s1398_s2, %s1407_s18  ;;  %s248_s8 = scalar_lea.vmem [#allocation8], %s1212_s14 }
  0x5e   : > { %s256_s9 = sshll.u32 %s248_s8, 4  ;;  %s853_s1 = scalar_lea.hbm %s1220_s28, 128  ;;  %s257_s9 = int_to_ptr.vmem [resolvable:$true] %s256_s9 }
  0x5f   : > { %p854_p6 = scmp.ne.s32.totalorder %s1220_s28, %s853_s1  ;;  %p1421_p5 = scmp.ne.s32.totalorder %s1417_s12, 0 }
  0x60   : > { %s858_s24 = scalar_lea.hbm %s1398_s2, 256  ;;  %p859_p11 = scmp.lt.u32.totalorder %s1220_s28, %s1398_s2 }
  0x61   : > { %p855_p1 = pneg %p1421_p5  ;;  %p860_p12 = scmp.lt.u32.totalorder %s858_s24, %s853_s1 }
  0x62   : > { %p862_p4 = scmp.lt.u32.totalorder %s853_s1, %s1220_s28 }
  0x63   : > { %p856_p2 = pnand %p855_p1, %p854_p6  ;;  %p861_p7 = por %p860_p12, %p859_p11 }
  0x65   : > { %p857_p10 = pneg %p856_p2  ;;  %p863_p8 = por %p862_p4, %p861_p7 }
  0x67   : > { %p864_p9 = pnand %p863_p8, %p857_p10 }
  0x69   : > { %867 = shalt.err (!%p864_p9)
}
  0x6a   : > { %s868_s8 = scalar_lea.vmem %s257_s9, 128  ;;  %s1032_s18 = smov [#allocation8]  }
  0x6b   : > { %p869_p3 = scmp.ne.s32.totalorder %s257_s9, %s868_s8  ;;  %s873_s29 = sshll.u32 %s1032_s18, 4  ;;  %s874_s29 = int_to_ptr.vmem [resolvable:$false] %s873_s29 }
  0x6c   : > { %s875_s25 = scalar_lea.vmem %s874_s29, 256  ;;  %p876_p6 = scmp.lt.s32.totalorder %s257_s9, %s874_s29 }
  0x6d   : > { %p871_p13 = pnand %p869_p3, %p855_p1  ;;  %p877_p2 = scmp.lt.s32.totalorder %s875_s25, %s868_s8 }
  0x6f   : > { %p872_p0 = pneg %p871_p13  ;;  %p878_p11 = por %p877_p2, %p876_p6 }
  0x71   : > { %p879_p12 = pnand %p878_p11, %p872_p0 }
  0x73   : > { %882 = shalt.err (!%p879_p12)
}
  0x74   : > { %702 = dma.hbm_to_vmem [thread:$0]  (!%p1421_p5), %s1220_s28, 128, %s257_s9, %s1158_s13  }
  0x75   : > { %s1422_s10 = sshll.u32 %s1024_s21, 7  ;;  %s267_s11 = scalar_lea.vmem [#allocation9], %s1212_s14 }
  0x76   : > { %s1250_s18 = scalar_lea.hbm %s1399_s3, %s1422_s10  ;;  %s275_s8 = sshll.u32 %s267_s11, 4  ;;  %s276_s8 = int_to_ptr.vmem [resolvable:$true] %s275_s8 }
  0x77   : > { %s1423_s29 = sand.u32 1, %s1008_s17   ;;  %s883_s0 = scalar_lea.hbm %s1250_s18, 128 }
  0x78   : > { %s264_s25 = scalar_lea.sflag [#allocation10], %s1423_s29  ;;  %p884_p10 = scmp.ne.s32.totalorder %s1250_s18, %s883_s0 }
  0x79   : > { %s888_s9 = scalar_lea.hbm %s1399_s3, 256  ;;  %p889_p8 = scmp.lt.u32.totalorder %s1250_s18, %s1399_s3 }
  0x7a   : > { %p886_p7 = pnand %p884_p10, %p855_p1  ;;  %p890_p9 = scmp.lt.u32.totalorder %s888_s9, %s883_s0 }
  0x7b   : > { %p892_p13 = scmp.lt.u32.totalorder %s883_s0, %s1250_s18 }
  0x7c   : > { %p887_p4 = pneg %p886_p7  ;;  %p891_p3 = por %p890_p9, %p889_p8 }
  0x7e   : > { %p893_p0 = por %p892_p13, %p891_p3 }
  0x80   : > { %p894_p6 = pnand %p893_p0, %p887_p4 }
  0x82   : > { %897 = shalt.err (!%p894_p6)
}
  0x83   : > { %s898_s14 = scalar_lea.vmem %s276_s8, 128  ;;  %s1033_s24 = smov [#allocation9]  }
  0x84   : > { %p899_p2 = scmp.ne.s32.totalorder %s276_s8, %s898_s14  ;;  %s903_s11 = sshll.u32 %s1033_s24, 4  ;;  %s904_s11 = int_to_ptr.vmem [resolvable:$false] %s903_s11 }
  0x85   : > { %s905_s29 = scalar_lea.vmem %s904_s11, 256  ;;  %p906_p10 = scmp.lt.s32.totalorder %s276_s8, %s904_s11 }
  0x86   : > { %p901_p11 = pnand %p899_p2, %p855_p1  ;;  %p907_p7 = scmp.lt.s32.totalorder %s905_s29, %s898_s14 }
  0x88   : > { %p902_p12 = pneg %p901_p11  ;;  %p908_p8 = por %p907_p7, %p906_p10 }
  0x8a   : > { %p909_p9 = pnand %p908_p8, %p902_p12 }
  0x8c   : > { %912 = shalt.err (!%p909_p9)
}
  0x8d   : > { %705 = dma.hbm_to_vmem [thread:$0]  (!%p1421_p5), %s1250_s18, 128, %s276_s8, %s264_s25  }
  0x8e   : > { %p1424_p4 = scmp.ne.s32.totalorder %s1419_s26, 0 }
  0x8f   : > { %s286_s0 = sand.u32 (!%p1424_p4), 1, %s1016_s19   ;;  %p1425_p1 = scmp.ne.s32.totalorder (!%p1424_p4), %s1412_s27, 0 }
  0x90   : > { %284 = sbr.rel (%p1424_p4) target bundleno = 941 (0x3ad), region = 36  ;;  %s671_s13 = sshll.u32 (!%p1424_p4), %s286_s0, 3 }
  0x91   : > { %s287_s28 = scalar_lea.sflag (!%p1424_p4), [#allocation4], %s286_s0  ;;  %s290_s9 = scalar_lea.vmem (!%p1424_p4), [#allocation3], %s671_s13 }
  0x97   : > { %978 = dma.done.wait (%p1425_p1), %s287_s28, 128  }
  0x98   : > { %980 = vsyncadd (%p1425_p1), %s287_s28, 4294967168  ;;  %s295_s10 = sand.u32 1, %s1100_s23   ;;  %s299_s1 = scalar_lea.vmem [#allocation6], %s671_s13 }
  0x99   : > { %s296_s12 = scalar_lea.sflag [#allocation7], %s295_s10 }
  0x9a   : > { %982 = dma.done.wait (%p1425_p1), %s296_s12, 128  }
  0x9b   : > { %984 = vsyncadd (%p1425_p1), %s296_s12, 4294967168  ;;  %s1287_s26 = sand.u32 1, %s1004_s16   ;;  %p1426_p5 = scmp.ne.s32.totalorder %s1413_s5, 0 }
  0x9c   : > { %s1290_s18 = sshll.u32 %s1287_s26, 3 }
  0x9d   : > { %s308_s8 = scalar_lea.vmem [#allocation8], %s1290_s18 }
  0x9e   : > { %986 = dma.done.wait (%p1426_p5), %s296_s12, 128  }
  0x9f   : > { %988 = vsyncadd (%p1426_p5), %s296_s12, 4294967168  ;;  %s314_s23 = scalar_lea.sflag [#allocation10], %s1287_s26  ;;  %s317_s27 = scalar_lea.vmem [#allocation9], %s1290_s18 }
  0xa0   : > { %990 = dma.done.wait (%p1426_p5), %s314_s23, 128  }
  0xa1   : > { %992 = vsyncadd (%p1426_p5), %s314_s23, 4294967168  ;;  %vm412_vm0 = vcmask 523264   ;;  %v406_v0 = vld [vmem:[%s299_s1] sm:$0xff]  ;;  %v405_v2 = vld [vmem:[%s290_s9] sm:$0xff]  ;;  %v363_v4 = vlaneseq  ;;  %s676_s5 = sshll.u32 %s1020_s20, 10  ;;  %v1034_v47 = vmov 0.0  }
  0xa2   : > { %v413_v1 = vsel %vm412_vm0, %v406_v0, -inf  ;;  %v433_v3 = vsel %vm412_vm0, %v405_v2, -inf  ;;  %v370_v16 = vld [vmem:[%s308_s8] sm:$0xff]  ;;  %v379_v22 = vstv %s676_s5  ;;  %v371_v24 = vld [vmem:[%s317_s27] sm:$0xff]  ;;  %369 = vst [vmem:[#allocation2] sm:$0x1] %v1034_v47 }
  0xa3   : > { %414 = vmax.xlane.f32.xlu0 %v413_v1  ;;  %434 = vmax.xlane.f32.xlu1 %v433_v3  ;;  %v1305_v5 = vand.u32 127, %v363_v4  ;;  %v677_v17 = vmul.f32 -1.442695, %v370_v16  ;;  %v1310_v20 = vshrl.u32 %v363_v4, 7  ;;  %s678_s25 = sshll.u32 %s1020_s20, 3  ;;  %vm468_vm8 = vcmask 1040384  }
  0xa4   : > { %v409_v53 = vstv %s678_s25  ;;  %s680_s14 = sshll.u32 %s1020_s20, 7  ;;  %s356_s24 = scalar_lea.vmem [#allocation11], %s1290_s18 }
  0xa5   : > { %v378_v21 = vmul.u32 128, %v1310_v20  ;;  %vm401_vm5 = vcmp.eq.s32.totalorder %v1305_v5, 1  ;;  %v410_v55 = vadd.s32 %v409_v53, %v1310_v20  ;;  %vm458_vm7 = vcmp.eq.s32.totalorder %v1305_v5, 0  ;;  %s512_s11 = sshll.u32 %s356_s24, 4  ;;  %s1342_s13 = scalar_lea.hbm %s1400_s4, %s680_s14  ;;  %s1344_s11 = int_to_ptr.vmem [resolvable:$true] %s512_s11 }
  0xa6   : > { %vm479_vm9 = vcmp.eq.s32.totalorder %v1305_v5, 2  ;;  %vm495_vm10 = vcmp.eq.s32.totalorder %v1310_v20, 0  ;;  %s499_s20 = scalar_lea.sflag [#allocation5], %s1287_s26  ;;  %s913_s28 = scalar_lea.vmem %s1344_s11, 128 }
  0xa7   : > { %v380_v25 = vadd.s32 %v379_v22, %v378_v21  ;;  %vm411_vm6 = vcmp.lt.s32.totalorder %v410_v55, 8  ;;  %p914_p3 = scmp.ne.s32.totalorder %s1344_s11, %s913_s28  ;;  %p1427_p13 = scmp.ne.s32.totalorder %s1414_s6, 0 }
  0xa8   : > { %s1035_s9 = smov [#allocation11]  }
  0xa9   : > { %v381_v28 = vadd.s32 %v380_v25, %v1305_v5  ;;  %v400_v49 = vld [vmem:[#allocation2] sm:$0x1]  ;;  %p915_p0 = pnand %p914_p3, %p1427_p13  ;;  %s917_s10 = sshll.u32 %s1035_s9, 4  ;;  %s918_s10 = int_to_ptr.vmem [resolvable:$false] %s917_s10 }
  0xaa   : > { %s919_s12 = scalar_lea.vmem %s918_s10, 256  ;;  %p920_p2 = scmp.lt.s32.totalorder %s1344_s11, %s918_s10 }
  0xab   : > { %vm390_vm3 = vcmp.lt.s32.totalorder %v381_v28, 8  ;;  %p916_p6 = pneg %p915_p0  ;;  %p921_p11 = scmp.lt.s32.totalorder %s919_s12, %s913_s28 }
  0xad   : > { %p922_p12 = por %p921_p11, %p920_p2 }
  0xaf   : > { %p923_p10 = pnand %p922_p12, %p916_p6 }
 0x130   : > { %v415_v6 = vpop.xlane.xlu0 %414  ;;  %v435_v11 = vpop.xlane.xlu1 %434 }
 0x131   : > { %vm416_vm1 = vcmp.eq.f32.partialorder %v406_v0, %v415_v6  ;;  %v436_v12 = vsub.f32 %v405_v2, %v435_v11 }
 0x132   : > { %v417_v7 = vsel %vm416_vm1, %v1305_v5, 64 }
 0x133   : > { %v418_v8 = vsel %vm412_vm0, %v417_v7, 2147483647  ;;  %v437_v13 = vmul.f32 1.442695, %v436_v12 }
 0x134   : > { %v420_v9 = vshra.s32 %v418_v8, 16  ;;  %v419_v26 = vand.u32 65535, %v418_v8 }
 0x135   : > { %785 = vpow2.f32 %v437_v13 }
 0x136   : > { %v422_v10 = vcvt.s32.f32 %v420_v9  ;;  %787 = vpow2.f32 %v677_v17  ;;  %v421_v30 = vcvt.s32.f32 %v419_v26 }
 0x138   : > { %423 = vmin.xlane.f32.xlu0 %v422_v10 }
 0x13f   : > { %v786_v14 = vpop.eup %785 }
 0x140   : > { %v439_v15 = vsel %vm412_vm0, %v786_v14, 0.0  ;;  %v788_v18 = vpop.eup %787 }
 0x141   : > { %440 = vadd.xlane.f32.xlu0 %v439_v15  ;;  %v385_v19 = vadd.f32 1.0, %v788_v18 }
 0x143   : > { %789 = vrcp.f32 %v385_v19 }
 0x14d   : > { %v790_v23 = vpop.eup %789 }
 0x14e   : > { %v388_v27 = vsub.f32 %v790_v23, %v371_v24 }
 0x150   : > { %v389_v31 = vmul.f32 %v388_v27, %v388_v27 }
 0x152   : > { %v391_v33 = vsel %vm390_vm3, %v389_v31, 0.0 }
 0x1c5   : > { %v424_v29 = vpop.xlane.xlu0 %423 }
 0x1c6   : > { %vm425_vm2 = vcmp.eq.f32.partialorder %v422_v10, %v424_v29  ;;  %v430_v34 = vcvt.f32.s32 %v424_v29 }
 0x1c7   : > { %v426_v32 = vsel %vm425_vm2, %v421_v30, inf }
 0x1c8   : > { %427 = vmin.xlane.f32.xlu1 %v426_v32  ;;  %v431_v36 = vshll.u32 %v430_v34, 16 }
 0x1cc   : > { %392 = vadd.xlane.f32.xlu1 %v391_v33 }
 0x1ce   : > { %v441_v52 = vpop.xlane.xlu0 %440 }
 0x1cf   : > { %791 = vlog2.f32 %v441_v52 }
 0x1d9   : > { %v792_v54 = vpop.eup %791 }
 0x1da   : > { %v443_v56 = vmul.f32 0.6931472, %v792_v54 }
 0x255   : > { %v428_v35 = vpop.xlane.xlu1 %427 }
 0x256   : > { %v429_v37 = vcvt.f32.s32 %v428_v35 }
 0x258   : > { %v432_v38 = vadd.s32 %v431_v36, %v429_v37 }
 0x259   : > { %v393_v39 = vpop.xlane.xlu1 %392 }
 0x25a   : > { %vm444_vm4 = vcmp.eq.s32.totalorder %v417_v7, %v432_v38  ;;  %v394_v40 = vrot.slane %v393_v39, 4 }
 0x25b   : > { %v445_v41 = vsel %vm444_vm4, %v436_v12, 0.0  ;;  %v482_v12 = vsub.s32 0, %v1310_v20 }
 0x25c   : > { %v446_v42 = vsel %vm412_vm0, %v445_v41, 0.0  ;;  %v395_v43 = vadd.f32 %v394_v40, %v393_v39 }
 0x25d   : > { %447 = vadd.xlane.f32.xlu0 %v446_v42 }
 0x25e   : > { %v396_v44 = vrot.slane %v395_v43, 2 }
 0x260   : > { %v397_v45 = vadd.f32 %v396_v44, %v395_v43 }
 0x262   : > { %v398_v46 = vrot.slane %v397_v45, 1 }
 0x264   : > { %v399_v48 = vadd.f32 %v398_v46, %v397_v45 }
 0x266   : > { %v402_v50 = vsel %vm401_vm5, %v399_v48, 0.0 }
 0x267   : > { %v403_v51 = vadd.f32 %v402_v50, %v400_v49 }
 0x269   : > { %404 = vst [vmem:[#allocation2] sm:$0x1] %v403_v51 }
 0x270   : > { %v457_v3 = vld [vmem:[#allocation2] sm:$0x1] }
 0x2ea   : > { %v448_v57 = vpop.xlane.xlu0 %447 }
 0x2eb   : > { %v449_v58 = vsub.f32 %v443_v56, %v448_v57 }
 0x2ed   : > { %v450_v59 = vsel %vm411_vm6, %v449_v58, 0.0 }
 0x2ee   : > { %v451_v60 = vrot.slane %v450_v59, 4 }
 0x2f0   : > { %v452_v61 = vadd.f32 %v451_v60, %v450_v59 }
 0x2f2   : > { %v453_v62 = vrot.slane %v452_v61, 2 }
 0x2f4   : > { %v454_v63 = vadd.f32 %v453_v62, %v452_v61 }
 0x2f6   : > { %v455_v0 = vrot.slane %v454_v63, 1 }
 0x2f8   : > { %v456_v1 = vadd.f32 %v455_v0, %v454_v63 }
 0x2fa   : > { %v459_v2 = vsel %vm458_vm7, %v456_v1, 0.0 }
 0x2fb   : > { %v460_v4 = vadd.f32 %v459_v2, %v457_v3 }
 0x2fd   : > { %461 = vst [vmem:[#allocation2] sm:$0x1] %v460_v4 }
 0x304   : > { %v465_v6 = vld [vmem:[#allocation2] sm:$0x1] }
 0x305   : > { %v466_v7 = vmul.f32 0.125, %v465_v6 }
 0x307   : > { %v472_v8 = vsel %vm401_vm5, %v466_v7, 0.0  ;;  %v467_v9 = vsel %vm458_vm7, %v466_v7, 0.0 }
 0x308   : > { %v473_v10 = vsel %vm468_vm8, %v472_v8, 0.0  ;;  %v469_v11 = vsel %vm468_vm8, %v467_v9, 0.0 }
 0x309   : > { %474 = vadd.xlane.f32.xlu0 %v473_v10  ;;  %470 = vadd.xlane.f32.xlu1 %v469_v11 }
 0x396   : > { %v475_v13 = vpop.xlane.xlu0 %474  ;;  %v471_v14 = vpop.xlane.xlu1 %470 }
 0x397   : > { %v477_v15 = vmul.f32 0.85, %v475_v13  ;;  %v483_v16 = vrot.slane %v475_v13, %v482_v12  ;;  %v476_v17 = vmul.f32 0.15, %v471_v14  ;;  %v488_v18 = vrot.slane %v471_v14, %v482_v12 }
 0x399   : > { %v484_v19 = vsel %vm479_vm9, %v483_v16, 0.0  ;;  %v478_v21 = vadd.f32 %v477_v15, %v476_v17 }
 0x39a   : > { %v489_v23 = vsel %vm401_vm5, %v488_v18, %v484_v19 }
 0x39b   : > { %v493_v22 = vrot.slane %v478_v21, %v482_v12 }
 0x39d   : > { %v494_v24 = vsel %vm458_vm7, %v493_v22, %v489_v23 }
 0x39e   : > { %v496_v25 = vsel %vm495_vm10, %v494_v24, 0.0 }
 0x39f   : > { %497 = vst [vmem:[%s356_s24] sm:$0xff] %v496_v25 }
 0x3a0   : > { %926 = shalt.err (!%p923_p10)
}
 0x3a1   : > { %s927_s1 = scalar_lea.hbm %s1342_s13, 128  ;;  %s931_s8 = scalar_lea.hbm %s1400_s4, 256 }
 0x3a2   : > { %p928_p7 = scmp.ne.s32.totalorder %s1342_s13, %s927_s1  ;;  %p932_p4 = scmp.lt.u32.totalorder %s1342_s13, %s1400_s4 }
 0x3a3   : > { %p933_p1 = scmp.lt.u32.totalorder %s931_s8, %s927_s1  ;;  %p935_p3 = scmp.lt.u32.totalorder %s927_s1, %s1342_s13 }
 0x3a4   : > { %p929_p8 = pnand %p928_p7, %p1427_p13 }
 0x3a5   : > { %p934_p5 = por %p933_p1, %p932_p4 }
 0x3a6   : > { %p930_p9 = pneg %p929_p8 }
 0x3a7   : > { %p936_p0 = por %p935_p3, %p934_p5 }
 0x3a9   : > { %p937_p6 = pnand %p936_p0, %p930_p9 }
 0x3ab   : > { %940 = shalt.err (!%p937_p6)
}
 0x3ac   : > { %691 = dma.vmem_to_hbm [thread:$0]  (%p1427_p13), %s1344_s11, 128, %s1342_s13, %s499_s20  }
 0x3ad PF: > { %s524_s5 = sand.u32 1, %s1000_s15   ;;  %p1428_p2 = scmp.ne.s32.totalorder %s1415_s7, 0 }
 0x3ae   : > { %p1429_p11 = scmp.ge.s32.totalorder %s1028_s22, 2  ;;  %s525_s25 = scalar_lea.sflag [#allocation5], %s524_s5 }
 0x3b0   : > { %p707_p12 = pnand %p1429_p11, %p1428_p2 }
 0x3b2   : > { %994 = dma.done.wait (!%p707_p12), %s525_s25, 128  }
 0x3b3   : > { %996 = vsyncadd (!%p707_p12), %s525_s25, 4294967168  ;;  %s26_s22 = sadd.s32 1, %s1028_s22   ;;  %s1430_s6 = sld [smem:[#allocation17_spill]] }
 0x3b4   : > { %p23_p10 = scmp.ge.s32.totalorder %s26_s22, 4   ;;  %s1431_s15 = smov %s1004_s16 }
 0x3b5   : > { %s1432_s16 = smov %s1008_s17  ;;  %s1433_s17 = smov %s1124_s30 }
 0x3b6   : > { %s1434_s18 = smov %s1016_s19  ;;  %s1386_s19 = smov 0  }
 0x3b7   : > { %s1435_s20 = smov %s1024_s21  ;;  %25 = sbr.rel (!%p23_p10) target bundleno = 14 (0xe), region = 126 }
 0x3b9   : > { %s1436_s21 = smov %s1430_s6 }
 0x3be   :  { %530 = vsyncpa [#allocation4], 1 }
 0x3bf   :  { %532 = vsyncpa [#allocation4 + $0x1], 1 }
 0x3c0   :  { %533 = vsyncpa [#allocation7], 1 }
 0x3c1   :  { %535 = vsyncpa [#allocation7 + $0x1], 1 }
 0x3c2   :  { %536 = vsyncpa [#allocation10], 1 }
 0x3c3   :  { %538 = vsyncpa [#allocation10 + $0x1], 1 }
 0x3c4   :  { %539 = vsyncpa [#allocation5], 1 }
 0x3c5   :  { %541 = vsyncpa [#allocation5 + $0x1], 1 }

</bundles_post_ra>
